<compile_context>
chip_gen: v7x
topology: tpu7x:2x2x1
jax: 0.10.0
libtpu: 0.0.40
codegen_flags: <defaults>
</compile_context>

<pallas_src>
import jax
import jax.numpy as jnp
from jax.experimental import pallas as pl
from jax.experimental.pallas import tpu as pltpu

LANE = 128             # vreg lane width (last dim)
ROW_ALIGN = 16         # sublane alignment: covers f32 (8,128) and bf16 (16,128)
MAX_BLOCK_ROWS = 8192  # 8192 x 128 f32 = 4 MiB per grid step


def _cdiv(a, b):
    return -(-a // b)


def _round_up(a, m):
    return _cdiv(a, m) * m


def _sumsq_kernel(x_ref, o_ref, acc_ref):
    """acc (8,128) += vreg-wise fold of x^2 over the block; scalar sum at end."""
    i = pl.program_id(0)

    @pl.when(i == 0)
    def _():
        acc_ref[...] = jnp.zeros_like(acc_ref)

    x = x_ref[...].astype(jnp.float32)
    # (block_rows, 128) -> (block_rows//8, 8, 128) is a pure relabeling (one
    # vreg per leading index), so the axis-0 sum is a chain of VPU vreg adds
    # (no XLU) into the tiny accumulator.
    acc_ref[...] += (x * x).reshape(-1, 8, LANE).sum(axis=0)

    @pl.when(i == pl.num_programs(0) - 1)
    def _():
        o_ref[0, 0] = jnp.sum(acc_ref[...])   # single cross-lane reduce


def _sum_of_squares(slab, nb, block_rows):
    """sum(slab**2) via a 1-D reduction grid; scalar result in SMEM."""
    return pl.pallas_call(
        _sumsq_kernel,
        out_shape=jax.ShapeDtypeStruct((1, 1), jnp.float32),
        grid=(nb,),
        in_specs=[pl.BlockSpec((block_rows, LANE), lambda i: (i, 0))],
        out_specs=pl.BlockSpec(memory_space=pltpu.MemorySpace.SMEM),
        scratch_shapes=[pltpu.VMEM((8, LANE), jnp.float32)],
        compiler_params=pltpu.CompilerParams(
            dimension_semantics=("arbitrary",),
            vmem_limit_bytes=32 * 1024 * 1024,
        ),
    )(slab)


def gan_loss_dg(discrim_hat_p, discrim_p):
    """JAX/Pallas equivalent of GANLoss_DG.forward (single fused kernel)."""
    # Each segment contributes mean((x - t)^2) = sum(((x - t) / sqrt(n))^2).
    segments = []
    for hat_p, p in zip(discrim_hat_p, discrim_p):
        segments.append((p, 1.0))       # MSE(p, ones_like(p))
        segments.append((hat_p, 0.0))   # MSE(hat_p, zeros_like(hat_p))

    # TODO(synk): torch.mean of a zero-sized tensor is NaN; empty segments are
    # skipped here (contribute 0) instead of propagating NaN.
    segments = [(x, t) for (x, t) in segments if x.size > 0]
    if not segments:
        return {"d_loss": jnp.float32(0.0)}

    slab_dtype = jnp.result_type(*[x.dtype for x, _ in segments])

    # Fold sqrt(1/n) * (x - t) into the slab build (fuses with the concat).
    # Zero padding now contributes exactly 0, so no per-segment padding.
    parts = []
    for x, t in segments:
        n = int(x.size)
        y = (x.reshape(-1).astype(jnp.float32) - t) * (float(n) ** -0.5)
        parts.append(y.astype(slab_dtype))
    flat = parts[0] if len(parts) == 1 else jnp.concatenate(parts)

    # Pick block size: as large as possible (<= 4 MiB f32) while keeping rows a
    # multiple of 16 (legal for f32 and bf16 tiling); pad only the slab tail.
    total = int(flat.shape[0])
    rows = _round_up(_cdiv(total, LANE), ROW_ALIGN)
    nb = _cdiv(rows, MAX_BLOCK_ROWS)
    block_rows = _round_up(_cdiv(rows, nb), ROW_ALIGN)
    total_rows = nb * block_rows
    pad = total_rows * LANE - total
    if pad:
        flat = jnp.concatenate([flat, jnp.zeros((pad,), dtype=slab_dtype)])
    slab = flat.reshape(total_rows, LANE)

    out = _sum_of_squares(slab, nb, block_rows)
    return {"d_loss": out[0, 0]}


if __name__ == "__main__":
    key = jax.random.PRNGKey(0)
    # Typical multi-scale / multi-period discriminator outputs: a list of
    # differently-shaped score maps (NCHW / NCT), small synthetic sizes.
    shapes = [(2, 1, 16, 16), (2, 1, 8, 8), (2, 4, 16)]
    keys = jax.random.split(key, 2 * len(shapes))

    discrim_hat_p = [
        jax.random.normal(keys[2 * i], s, dtype=jnp.float32)
        for i, s in enumerate(shapes)
    ]
    discrim_p = [
        jax.random.normal(keys[2 * i + 1], s, dtype=jnp.float32)
        for i, s in enumerate(shapes)
    ]

    out = gan_loss_dg(discrim_hat_p, discrim_p)
    d_loss = jax.block_until_ready(out["d_loss"])

    # Pure-JAX reference check.
    ref = jnp.float32(0.0)
    for hat_p, p in zip(discrim_hat_p, discrim_p):
        ref = ref + jnp.mean((p - 1.0) ** 2) + jnp.mean(hat_p ** 2)
    assert jnp.allclose(d_loss, ref, rtol=1e-5, atol=1e-5), (d_loss, ref)

    print("KERNEL_OK")
</pallas_src>

<mosaic_0001>
module attributes {stable_mosaic.version = 11 : i64} {
  func.func @_sumsq_kernel(%arg0: i32, %arg1: memref<16x128xf32, #tpu.memory_space<vmem>>, %arg2: memref<1x1xf32, #tpu.memory_space<smem>>, %arg3: memref<8x128xf32, #tpu.memory_space<vmem>>) attributes {dimension_semantics = [#tpu.dimension_semantics<arbitrary>], iteration_bounds = array<i64: 1>, scalar_prefetch = 0 : i64, scratch_operands = 1 : i64, tpu.core_type = #tpu.core_type<tc>, window_params = [{transform_indices = @transform_0, window_bounds = array<i64: 16, 128>}, {transform_indices = @transform_1, window_bounds = array<i64: 1, 1>}]} {
    %c0_i32 = arith.constant 0 : i32
    %0 = arith.cmpi eq, %arg0, %c0_i32 : i32
    %1 = arith.extui %0 : i1 to i32
    %c0_i32_0 = arith.constant 0 : i32
    %2 = arith.cmpi ne, %1, %c0_i32_0 : i32
    scf.if %2 {
      %cst_8 = arith.constant 0.000000e+00 : f32
      %13 = vector.broadcast %cst_8 : f32 to vector<8x128xf32>
      %c0_9 = arith.constant 0 : index
      %c0_10 = arith.constant 0 : index
      %14 = vector.load %arg3[%c0_9, %c0_10] : memref<8x128xf32, #tpu.memory_space<vmem>>, vector<8x128xf32>
      tpu.vector_store %arg3[%c0_9, %c0_10], %13 {strides = array<i32>} : memref<8x128xf32, #tpu.memory_space<vmem>>, vector<8x128xf32>,
    } else {
    }
    %c0 = arith.constant 0 : index
    %c0_1 = arith.constant 0 : index
    %3 = vector.load %arg1[%c0, %c0_1] : memref<16x128xf32, #tpu.memory_space<vmem>>, vector<16x128xf32>
    %c0_2 = arith.constant 0 : index
    %c0_3 = arith.constant 0 : index
    %4 = vector.load %arg3[%c0_2, %c0_3] : memref<8x128xf32, #tpu.memory_space<vmem>>, vector<8x128xf32>
    %5 = arith.mulf %3, %3 : vector<16x128xf32>
    %6 = vector.shape_cast %5 : vector<16x128xf32> to vector<2x8x128xf32>
    %cst = arith.constant dense<0.000000e+00> : vector<8x128xf32>
    %7 = vector.multi_reduction <add>, %6, %cst [0] : vector<2x8x128xf32> to vector<8x128xf32>
    %8 = arith.addf %4, %7 : vector<8x128xf32>
    %c0_4 = arith.constant 0 : index
    %c0_5 = arith.constant 0 : index
    %9 = vector.load %arg3[%c0_4, %c0_5] : memref<8x128xf32, #tpu.memory_space<vmem>>, vector<8x128xf32>
    tpu.vector_store %arg3[%c0_4, %c0_5], %8 {strides = array<i32>} : memref<8x128xf32, #tpu.memory_space<vmem>>, vector<8x128xf32>,
    %c0_i32_6 = arith.constant 0 : i32
    %10 = arith.cmpi eq, %arg0, %c0_i32_6 : i32
    %11 = arith.extui %10 : i1 to i32
    %c0_i32_7 = arith.constant 0 : i32
    %12 = arith.cmpi ne, %11, %c0_i32_7 : i32
    scf.if %12 {
      %c0_8 = arith.constant 0 : index
      %c0_9 = arith.constant 0 : index
      %13 = vector.load %arg3[%c0_8, %c0_9] : memref<8x128xf32, #tpu.memory_space<vmem>>, vector<8x128xf32>
      %14 = vector.shape_cast %13 : vector<8x128xf32> to vector<1x8x128xf32>
      %cst_10 = arith.constant dense<0.000000e+00> : vector<1xf32>
      %15 = vector.multi_reduction <add>, %14, %cst_10 [1, 2] : vector<1x8x128xf32> to vector<1xf32>
      %16 = vector.shape_cast %15 : vector<1xf32> to vector<1x1x1xf32>
      %17 = vector.extract %16[0, 0, 0] : f32 from vector<1x1x1xf32>
      %c0_11 = arith.constant 0 : index
      %c0_12 = arith.constant 0 : index
      %18 = memref.load %arg2[%c0_11, %c0_12] : memref<1x1xf32, #tpu.memory_space<smem>>
      memref.store %17, %arg2[%c0_11, %c0_12] : memref<1x1xf32, #tpu.memory_space<smem>>
    } else {
    }
    return
  }
  func.func @transform_0(%arg0: i32) -> (i32, i32) {
    %c0_i32 = arith.constant 0 : i32
    %c0_i32_0 = arith.constant 0 : i32
    return %arg0, %c0_i32 : i32, i32
  }
  func.func @transform_1(%arg0: i32) -> (i32, i32) {
    %c0_i32 = arith.constant 0 : i32
    %c0_i32_0 = arith.constant 0 : i32
    %c0_i32_1 = arith.constant 0 : i32
    return %c0_i32, %c0_i32_0 : i32, i32
  }
}

</mosaic_0001>

<bundles_post_ra>
// kernel: tpu_custom_call.1
= control target key start
LH: loop header
LB: loop body
LE: loop exit
PB: predicated region body
PF: predicated region fallthrough
CT: control target
= control target key end

     0   :  { %6 = vsyncpa [#allocation4], 0  ;;  %s145_s0 = inlined_call_operand.hbm [shape: f32[16,128], index: 0, kind: input, shape index: {}]   ;;  %s146_s1 = inlined_call_operand.hbm [shape: f32[1,1], index: 1, kind: output, shape index: {}]  }
   0x1   :  { %7 = vsyncpa [#allocation5], 0  ;;  %s107_s6 = smov [#allocation3]   ;;  %s71_s10 = scalar_lea.hbm %s145_s0, 256 }
   0x2   :  { %s13_s7 = sshll.u32 %s107_s6, 4  ;;  %p72_p0 = scmp.ne.s32.totalorder %s145_s0, %s71_s10  ;;  %s14_s7 = int_to_ptr.vmem [resolvable:$true] %s13_s7 }
   0x3   :  { %p75_p1 = scmp.lt.u32.totalorder %s71_s10, %s145_s0 }
   0x5   :  { %p77_p2 = pnand %p75_p1, %p72_p0 }
   0x7   :  { %80 = shalt.err (!%p77_p2)
}
   0x8   :  { %s81_s15 = scalar_lea.vmem %s14_s7, 256  ;;  %p86_p4 = scmp.lt.s32.totalorder %s14_s7, %s14_s7 }
   0x9   :  { %p82_p3 = scmp.ne.s32.totalorder %s14_s7, %s81_s15  ;;  %p87_p5 = scmp.lt.s32.totalorder %s81_s15, %s81_s15 }
   0xb   :  { %p88_p6 = por %p87_p5, %p86_p4 }
   0xd   :  { %p89_p7 = pnand %p88_p6, %p82_p3 }
   0xf   :  { %92 = shalt.err (!%p89_p7)
}
  0x10   :  { %s108_s16 = smov 128   ;;  %s109_s17 = smov 8  }
  0x11   :  { %19 = dma.hbm_to_vmem [thread:$0]  %s145_s0, 256, %s14_s7, [#allocation4], %s108_s16, %s108_s16, %s109_s17  }
  0x12   :  { %103 = dma.done.wait [#allocation4], 256  }
  0x13   :  { %104 = vsyncadd [#allocation4], 4294967040  ;;  %v28_v0 = vld [vmem:[#allocation3] sm:$0xff]  ;;  %v29_v1 = vld [vmem:[#allocation3 + $0x8] sm:$0xff]  ;;  %s93_s22 = scalar_lea.hbm %s146_s1, 16 }
  0x14   :  { %v31_v2 = vmul.f32 %v28_v0, %v28_v0  ;;  %v32_v3 = vmul.f32 %v29_v1, %v29_v1  ;;  %p94_p8 = scmp.ne.s32.totalorder %s146_s1, %s93_s22  ;;  %p97_p9 = scmp.lt.u32.totalorder %s93_s22, %s146_s1 }
  0x16   :  { %v33_v4 = vadd.f32 %v32_v3, %v31_v2  ;;  %p99_p10 = pnand %p97_p9, %p94_p8 }
  0x18   :  { %40 = vadd.xlane.f32.xlu0 %v33_v4 }
  0xa5   :  { %v41_v5 = vpop.xlane.xlu0 %40 }
  0xa6   :  { %v42_v6 = vrot.slane %v41_v5, 4 }
  0xa8   :  { %v43_v7 = vadd.f32 %v42_v6, %v41_v5 }
  0xaa   :  { %v44_v8 = vrot.slane %v43_v7, 2 }
  0xac   :  { %v45_v9 = vadd.f32 %v44_v8, %v43_v7 }
  0xae   :  { %v46_v10 = vrot.slane %v45_v9, 1 }
  0xb0   :  { %v47_v11 = vadd.f32 %v46_v10, %v45_v9 }
  0xb2   :  { %65 = vpush %v47_v11 }
  0xe3   :  { %s66_s20 = spop %65 }
  0xe4   :  { %50 = sst [smem:[#allocation6]] %s66_s20 }
  0xe5   :  { %102 = shalt.err (!%p99_p10)
}
  0xe6   :  { %s110_s27 = smov [#allocation6]  }
  0xe7   :  { %58 = dma.smem_to_hbm %s110_s27, 16, %s146_s1, [#allocation5]  }
  0xe8   :  { %105 = dma.done.wait [#allocation5], 16  }
  0xe9   :  { %106 = vsyncadd [#allocation5], 4294967280 }
  0xea   :  { %62 = sfence }
  0xeb   :  { %63 = vsyncpa [#allocation4], 1 }
  0xec   :  { %64 = vsyncpa [#allocation5], 1 }

</bundles_post_ra>
